<compile_context>
chip_gen: v7x
topology: tpu7x:2x2x1
jax: 0.10.0
libtpu: 0.0.40
codegen_flags: <defaults>
</compile_context>

<pallas_src>
import math

import jax
import jax.numpy as jnp
from jax.experimental import pallas as pl
from jax.experimental.pallas import tpu as pltpu


def _round_up(a: int, b: int) -> int:
    return -(-a // b) * b


def _tied_spline_matmul_kernel(x_ref, w_ref, o_ref):
    # x_ref: (tm, K) activation row tile, stored dtype (cast here, not in the
    #        wrapper, so no extra HBM pass over x)
    # w_ref: (K, tn) tied-weight column tile (compute dtype), resident across
    #        the row axis of the grid
    # o_ref: (tm, tn) output tile at exact O width (no padded lanes written)
    o_ref[...] = jnp.dot(
        x_ref[...].astype(w_ref.dtype),
        w_ref[...],
        preferred_element_type=jnp.float32,
    ).astype(o_ref.dtype)


def _vmem_budget_and_limit():
    """Generation-aware VMEM budget + scoped limit.

    Budget = half of physical VMEM, clamped to [16 MiB, 64 MiB]
    (v5e/v6e: 128 MiB physical -> 64 MiB budget; v7x: 64 MiB -> 32 MiB).
    Falls back to the most conservative (v7x) numbers if the query fails.
    """
    cap = None
    try:
        cap = getattr(pltpu.get_tpu_info(), "vmem_capacity_bytes", None)
    except Exception:
        cap = None
    if not cap:
        cap = 64 << 20
    budget = max(16 << 20, min(cap // 2, 64 << 20))
    limit = min(cap - (8 << 20), budget + (16 << 20))
    return budget, max(limit, budget)


def _pick_tiles(M, K, O, x_isz, w_isz, out_isz, budget):
    """Pick (tm, tn) so the (double-buffered, lane/sublane padded) VMEM
    footprint fits `budget`, favouring a fully resident weight (tn = O) and
    large row tiles."""
    K_lane = _round_up(K, 128)      # x-tile lane padding
    K_sub = _round_up(K, 8)         # weight-tile sublane padding

    def w_bytes(tn):
        # counted double-buffered: the pipeline allocates two buffers even
        # though the weight's block index never changes
        return 2 * K_sub * _round_up(tn, 128) * w_isz

    # --- column (O) tile: keep the whole weight resident unless it alone
    # would eat more than half the budget (mostly a v7x / huge-O concern).
    if w_bytes(O) <= budget // 2:
        tn = O
    else:
        tn = 2048
        while tn > 256 and w_bytes(tn) > budget // 2:
            tn //= 2
        tn = min(tn, _round_up(O, 128))
    tn_lane = _round_up(tn, 128)

    # --- row (M) tile: sublane alignment per dtype (8 f32 / 16 bf16 / 32 i8)
    align = max(8 * (4 // max(1, x_isz)), 8 * (4 // max(1, out_isz)), 8)
    M_up = _round_up(max(M, 1), align)

    def foot(tm):
        return (2 * tm * K_lane * x_isz        # double-buffered x row tiles
                + 2 * tm * tn_lane * out_isz   # double-buffered out tiles
                + w_bytes(tn))                 # (double-buffered) weight tile

    tm = _round_up(min(4096, M_up), align)     # big tiles: ~2-4+ MiB per step
    while tm > align and foot(tm) > budget:
        tm = _round_up(tm // 2, align)
    tm = max(align, min(tm, M_up))

    # keep at least 2 row blocks for large M so both v7x TensorCores get work
    if M >= 512 and tm >= M:
        tm = max(align, _round_up(pl.cdiv(M, 2), align))

    # TODO(synk): if foot(align) still exceeds the budget (very large
    # in_features*(degree+1)), add an innermost "arbitrary" K grid axis with a
    # pl.when-zeroed f32 VMEM accumulator instead of relying on a tiny tm.
    return tm, tn


def tied_spline_linear_fast(x, weighted_sum, weight, *, tm=None, tn=None,
                            compute_dtype=None):
    """Forward of tied_SplineLinear_FAST.

    x: (..., in_features, degree+1)   -- covers the 3-D/4-D/5-D torch branches
    weighted_sum: (out_features, in_features)
    weight: (out_features, degree+1)
    returns: (..., out_features) in x.dtype
    """
    *lead, I, Dp1 = x.shape
    O = weighted_sum.shape[0]
    assert weighted_sum.shape == (O, I)
    assert weight.shape == (O, Dp1)

    out_dtype = x.dtype
    if compute_dtype is None:
        compute_dtype = x.dtype

    M = math.prod(lead) if lead else 1
    K = I * Dp1

    # Tied weight, built ONCE in (K, O) layout (f32 outer product, then cast):
    #   W[i*(D+1)+d, o] = weighted_sum[o, i] * weight[o, d]
    ws_t = weighted_sum.astype(jnp.float32).T            # (I, O)
    w_t = weight.astype(jnp.float32).T                   # (D+1, O)
    w_kxo = (ws_t[:, None, :] * w_t[None, :, :]).reshape(K, O).astype(compute_dtype)

    # x stays in its stored dtype (any cast happens inside the kernel) and is
    # only reshaped (contiguous last-dim merge -> no HBM copy, no padding).
    x_flat = x.reshape(M, K)

    budget, vmem_limit = _vmem_budget_and_limit()
    auto_tm, auto_tn = _pick_tiles(
        M, K, O,
        jnp.dtype(x.dtype).itemsize,
        jnp.dtype(compute_dtype).itemsize,
        jnp.dtype(out_dtype).itemsize,
        budget,
    )
    if tm is None:
        tm = auto_tm
    if tn is None:
        tn = auto_tn

    grid = (pl.cdiv(M, tm), pl.cdiv(O, tn))   # ragged tails -> masked writes

    out = pl.pallas_call(
        _tied_spline_matmul_kernel,
        out_shape=jax.ShapeDtypeStruct((M, O), out_dtype),
        grid_spec=pltpu.PrefetchScalarGridSpec(
            num_scalar_prefetch=0,
            grid=grid,
            in_specs=[
                pl.BlockSpec((tm, K), lambda i, j: (i, 0)),   # pipelined x rows
                pl.BlockSpec((K, tn), lambda i, j: (0, j)),   # (near-)resident weight
            ],
            out_specs=pl.BlockSpec((tm, tn), lambda i, j: (i, j)),
        ),
        compiler_params=pltpu.CompilerParams(
            dimension_semantics=("parallel", "parallel"),  # row/col tiles shard across TCs
            vmem_limit_bytes=vmem_limit,
        ),
    )(x_flat, w_kxo)

    return out.reshape(*lead, O)


if __name__ == "__main__":
    key = jax.random.PRNGKey(0)

    # module hyper-params (small, consistent with the forward's einsum branches)
    B, H = 2, 8
    in_features, out_features, degree = 16, 32, 3
    init_scale = 0.1

    k1, k2, k3, k4 = jax.random.split(key, 4)
    # deterministic truncated-normal init (mean=0, std=init_scale),
    # mirroring nn.init.trunc_normal_ in reset_parameters().
    weight = (
        jax.random.truncated_normal(k1, -2.0, 2.0, (out_features, degree + 1))
        * init_scale
    ).astype(jnp.float32)
    weighted_sum = (
        jax.random.truncated_normal(k2, -2.0, 2.0, (out_features, in_features))
        * init_scale
    ).astype(jnp.float32)

    x = jax.random.normal(k3, (B, H, in_features, degree + 1), dtype=jnp.float32)

    # pure-JAX reference of the PyTorch forward
    w_full = weighted_sum[:, :, None] * weight[:, None, :]
    ref = jnp.einsum("bhid,oid->bho", x, w_full)

    # exact (f32) path — 4-D branch
    out = jax.block_until_ready(tied_spline_linear_fast(x, weighted_sum, weight))
    assert out.shape == (B, H, out_features)
    assert jnp.allclose(out, ref, atol=1e-5, rtol=1e-5)

    # bf16 matmul fast path (f32 weight build, in-kernel x cast, f32 accumulation)
    out_bf16 = jax.block_until_ready(
        tied_spline_linear_fast(x, weighted_sum, weight, compute_dtype=jnp.bfloat16)
    )
    assert out_bf16.shape == (B, H, out_features)
    assert jnp.allclose(out_bf16, ref, atol=1e-2, rtol=1e-2)

    # 3-D branch ('hid,oid->ho')
    x3 = jax.random.normal(k4, (H, in_features, degree + 1), dtype=jnp.float32)
    ref3 = jnp.einsum("hid,oid->ho", x3, w_full)
    out3 = jax.block_until_ready(tied_spline_linear_fast(x3, weighted_sum, weight))
    assert out3.shape == (H, out_features)
    assert jnp.allclose(out3, ref3, atol=1e-5, rtol=1e-5)

    print("KERNEL_OK")
</pallas_src>

<mosaic_0001>
module attributes {stable_mosaic.version = 11 : i64} {
  func.func @_tied_spline_matmul_kernel(%arg0: i32, %arg1: i32, %arg2: memref<16x64xf32, #tpu.memory_space<vmem>>, %arg3: memref<64x32xf32, #tpu.memory_space<vmem>>, %arg4: memref<16x32xf32, #tpu.memory_space<vmem>>) attributes {dimension_semantics = [#tpu.dimension_semantics<parallel>, #tpu.dimension_semantics<parallel>], iteration_bounds = array<i64: 1, 1>, scalar_prefetch = 0 : i64, scratch_operands = 0 : i64, tpu.core_type = #tpu.core_type<tc>, window_params = [{transform_indices = @transform_0, window_bounds = array<i64: 16, 64>}, {transform_indices = @transform_1, window_bounds = array<i64: 64, 32>}, {transform_indices = @transform_2, window_bounds = array<i64: 16, 32>}]} {
    %c0 = arith.constant 0 : index
    %c0_0 = arith.constant 0 : index
    %0 = vector.load %arg2[%c0, %c0_0] : memref<16x64xf32, #tpu.memory_space<vmem>>, vector<16x64xf32>
    %c0_1 = arith.constant 0 : index
    %c0_2 = arith.constant 0 : index
    %1 = vector.load %arg3[%c0_1, %c0_2] : memref<64x32xf32, #tpu.memory_space<vmem>>, vector<64x32xf32>
    %cst = arith.constant dense<0.000000e+00> : vector<16x32xf32>
    %2 = tpu.matmul %0, %1, %cst {dimension_numbers = #tpu.dot_dimension_numbers<[1], [0], [0], [1], [0, 0, 1, 1], [], []>} : vector<16x64xf32>, vector<64x32xf32>, vector<16x32xf32> -> vector<16x32xf32>
    %c0_3 = arith.constant 0 : index
    %c0_4 = arith.constant 0 : index
    %3 = vector.load %arg4[%c0_3, %c0_4] : memref<16x32xf32, #tpu.memory_space<vmem>>, vector<16x32xf32>
    tpu.vector_store %arg4[%c0_3, %c0_4], %2 {strides = array<i32>} : memref<16x32xf32, #tpu.memory_space<vmem>>, vector<16x32xf32>,
    return
  }
  func.func @transform_0(%arg0: i32, %arg1: i32) -> (i32, i32) {
    %c0_i32 = arith.constant 0 : i32
    %c0_i32_0 = arith.constant 0 : i32
    return %arg0, %c0_i32 : i32, i32
  }
  func.func @transform_1(%arg0: i32, %arg1: i32) -> (i32, i32) {
    %c0_i32 = arith.constant 0 : i32
    %c0_i32_0 = arith.constant 0 : i32
    return %c0_i32, %arg1 : i32, i32
  }
  func.func @transform_2(%arg0: i32, %arg1: i32) -> (i32, i32) {
    %c0_i32 = arith.constant 0 : i32
    return %arg0, %arg1 : i32, i32
  }
}

</mosaic_0001>

<bundles_post_ra>
// kernel: tpu_custom_call.1
= control target key start
LH: loop header
LB: loop body
LE: loop exit
PB: predicated region body
PF: predicated region fallthrough
CT: control target
= control target key end

     0   :  { %vm22_vm0 = vcmask 523264   ;;  %s259_s0 = inlined_call_operand.vmem [shape: f32[16,64], index: 0, kind: input, shape index: {}]   ;;  %s260_s1 = inlined_call_operand.vmem [shape: f32[64,32], index: 1, kind: input, shape index: {}]   ;;  %s261_s2 = inlined_call_operand.hbm [shape: f32[16,32], index: 2, kind: output, shape index: {}]  }
   0x1   :  { %v14_v0 = vld [vmem:[%s260_s1] sm:$0xff]  ;;  %v15_v1 = vld [vmem:[%s260_s1 + $0x8] sm:$0xff]  ;;  %v16_v2 = vld [vmem:[%s260_s1 + $0x10] sm:$0xff] }
   0x2   :  { %v154_v3 = vpack.c.bf16 %v15_v1, %v14_v0  ;;  %v17_v4 = vld [vmem:[%s260_s1 + $0x18] sm:$0xff]  ;;  %v18_v6 = vld [vmem:[%s260_s1 + $0x20] sm:$0xff]  ;;  %v19_v7 = vld [vmem:[%s260_s1 + $0x28] sm:$0xff] }
   0x3   :  { %v158_v5 = vpack.c.bf16 %v17_v4, %v16_v2  ;;  %v12_v8 = vld [vmem:[%s259_s0] sm:$0xff] }
   0x4   :  { %155 = vmatprep.subr.bf16.mxu0 %v154_v3  ;;  %151 = vmatprep.mubr.msk.f32.mxu0 %vm22_vm0, %v12_v8 }
   0x5   :  { %7 = vsyncpa [#allocation3], 0  ;;  %157 = vmatpush3.bf16.msra.mxu0 %v154_v3  ;;  %v162_v9 = vpack.c.bf16 %v19_v7, %v18_v6  ;;  %v20_v10 = vld [vmem:[%s260_s1 + $0x30] sm:$0xff]  ;;  %v21_v11 = vld [vmem:[%s260_s1 + $0x38] sm:$0xff]  ;;  %s197_s29 = smov [#allocation2]   ;;  %vm104_vm1 = vcmask 261120  }
   0x6   :  { %159 = vmatprep.subr.bf16.mxu0 %v158_v5  ;;  %v166_v12 = vpack.c.bf16 %v21_v11, %v20_v10  ;;  %v13_v13 = vld [vmem:[%s259_s0 + $0x8] sm:$0xff]  ;;  %s112_s30 = sshll.u32 %s197_s29, 4  ;;  %s113_s30 = int_to_ptr.vmem [resolvable:$true] %s112_s30 }
   0x7   :  { %s173_s1 = scalar_lea.vmem %s113_s30, 256  ;;  %p178_p1 = scmp.lt.s32.totalorder %s113_s30, %s113_s30 }
   0x8   :  { %p174_p0 = scmp.ne.s32.totalorder %s113_s30, %s173_s1  ;;  %p179_p2 = scmp.lt.s32.totalorder %s173_s1, %s173_s1 }
   0x9   :  { %161 = vmatpush3.bf16.msra.mxu0 %v158_v5 }
   0xa   :  { %163 = vmatprep.subr.bf16.mxu0 %v162_v9  ;;  %p180_p3 = por %p179_p2, %p178_p1 }
   0xc   :  { %p181_p4 = pnand %p180_p3, %p174_p0 }
   0xd   :  { %165 = vmatpush3.bf16.msra.mxu0 %v162_v9 }
   0xe   :  { %167 = vmatprep.subr.bf16.mxu0 %v166_v12 }
  0x11   :  { %169 = vmatpush3.bf16.msra.mxu0 %v166_v12 }
  0x14   :  { %152 = vmatmul.mubr.msk.f32.vlgmr.msra.gmra.mrb[0].mxu0 %vm22_vm0, %v13_v13 }
  0xe7   :  { %v153_v14 = vpop.f32.mrb[0].mxu0 }
  0xe8   :  { %106 = vst.msk [vmem:[#allocation2 + $0x8] sm:$0xff] %vm104_vm1, %v153_v14  ;;  %v95_v15 = vpop.f32.mrb[1].mxu0 }
  0xe9   :  { %105 = vst.msk [vmem:[#allocation2] sm:$0xff] %vm104_vm1, %v95_v15 }
  0xea   :  { %184 = shalt.err (!%p181_p4)
}
  0xeb   :  { %s185_s0 = scalar_lea.hbm %s261_s2, 256 }
  0xec   :  { %p186_p5 = scmp.ne.s32.totalorder %s261_s2, %s185_s0  ;;  %p189_p6 = scmp.lt.u32.totalorder %s185_s0, %s261_s2 }
  0xee   :  { %p191_p7 = pnand %p189_p6, %p186_p5 }
  0xf0   :  { %194 = shalt.err (!%p191_p7)
}
  0xf1   :  { %s198_s9 = smov 128   ;;  %s199_s10 = smov 8  }
  0xf2   :  { %118 = dma.vmem_to_hbm [thread:$0]  %s113_s30, 256, %s261_s2, [#allocation3], %s198_s9, %s198_s9, %s199_s10  }
  0xf3   :  { %195 = dma.done.wait [#allocation3], 256  }
  0xf4   :  { %196 = vsyncadd [#allocation3], 4294967040 }
  0xf5   :  { %122 = vsyncpa [#allocation3], 1 }

</bundles_post_ra>
